<compile_context>
chip_gen: v7x
topology: tpu7x:2x2x1
jax: 0.10.0
libtpu: 0.0.40
codegen_flags: <defaults>
</compile_context>

<pallas_src>
import functools

import jax
import jax.numpy as jnp
import numpy as np
from jax.experimental import pallas as pl
from jax.experimental.pallas import tpu as pltpu


def _rweights_kernel(x_ref, w1_ref, b1_ref, w2_ref, b2_ref, o_ref, acc_ref,
                     *, inv_hw):
    """One (batch tile, spatial tile) grid step.

    x_ref  : (TB, C, THW)  lane-dense spatial tile of the input
    w1_ref : (C, Hd)       first Linear weight (in, out layout)
    b1_ref : (1, Hd)
    w2_ref : (Hd, C)       second Linear weight (in, out layout)
    b2_ref : (1, C)
    o_ref  : (TB, C)       sigmoid channel weights for this batch tile
    acc_ref: (TB, C)       running spatial sum (VMEM scratch)
    """
    t = pl.program_id(1)
    nt = pl.num_programs(1)

    # Partial spatial sum of this tile: reduce over the lane axis.
    part = jnp.sum(x_ref[...].astype(jnp.float32), axis=-1)      # (TB, C)

    @pl.when(t == 0)
    def _():
        acc_ref[...] = part          # initialize with first tile (no zeros+add)

    @pl.when(t > 0)
    def _():
        acc_ref[...] = acc_ref[...] + part

    @pl.when(t == nt - 1)
    def _():
        avg = acc_ref[...] * inv_hw                               # (TB, C)
        h = jnp.dot(avg, w1_ref[...],
                    preferred_element_type=jnp.float32) + b1_ref[...]
        h = jnp.maximum(h, 0.0)
        y = jnp.dot(h, w2_ref[...],
                    preferred_element_type=jnp.float32) + b2_ref[...]
        o_ref[...] = (1.0 / (1.0 + jnp.exp(-y))).astype(o_ref.dtype)


def _pick_spatial_tile(hw, max_tile=2048):
    """Largest multiple-of-128 divisor of hw up to max_tile (else full hw)."""
    if hw % 128 != 0 or hw <= max_tile:
        return hw
    t = (max_tile // 128) * 128
    while t >= 128:
        if hw % t == 0:
            return t
        t -= 128
    return hw


def rweights_pallas(x_nchw, w1, b1, w2, b2):
    """RWeights.forward.

    x_nchw : (B, C, H, W) float32
    w1     : (C, Hd)  -- nn.Linear(dim, dim//reduction).weight transposed to (in, out)
    b1     : (Hd,)
    w2     : (Hd, C)  -- nn.Linear(dim//reduction, dim).weight transposed to (in, out)
    b2     : (C,)
    returns (B, C, 1, 1)
    """
    B, C, H, W = x_nchw.shape
    Hd = w1.shape[1]
    HW = H * W

    # Free view: H*W lands on the lane axis (lane-dense loads + reduction).
    x = x_nchw.reshape(B, C, HW)

    TB = B if B <= 8 else 8
    B_pad = ((B + TB - 1) // TB) * TB
    if B_pad != B:
        x = jnp.pad(x, ((0, B_pad - B), (0, 0), (0, 0)))

    THW = _pick_spatial_tile(HW)
    nb = B_pad // TB
    nt = HW // THW

    kernel = functools.partial(_rweights_kernel, inv_hw=1.0 / float(HW))

    out = pl.pallas_call(
        kernel,
        out_shape=jax.ShapeDtypeStruct((B_pad, C), jnp.float32),
        grid_spec=pltpu.PrefetchScalarGridSpec(
            num_scalar_prefetch=0,
            grid=(nb, nt),
            in_specs=[
                pl.BlockSpec((TB, C, THW), lambda b, t: (b, 0, t)),
                pl.BlockSpec((C, Hd), lambda b, t: (0, 0)),
                pl.BlockSpec((1, Hd), lambda b, t: (0, 0)),
                pl.BlockSpec((Hd, C), lambda b, t: (0, 0)),
                pl.BlockSpec((1, C), lambda b, t: (0, 0)),
            ],
            out_specs=pl.BlockSpec((TB, C), lambda b, t: (b, 0)),
            scratch_shapes=[pltpu.VMEM((TB, C), jnp.float32)],
        ),
        compiler_params=pltpu.CompilerParams(
            dimension_semantics=("parallel", "arbitrary")),
    )(x, w1, b1.reshape(1, Hd), w2, b2.reshape(1, C))

    return out[:B].reshape(B, C, 1, 1)


def _reference(x_nchw, w1, b1, w2, b2):
    """Pure-JAX reference matching the PyTorch module (inference)."""
    B, C, _, _ = x_nchw.shape
    avg = jnp.mean(x_nchw, axis=(2, 3))                  # AdaptiveAvgPool2d(1)
    h = jnp.maximum(avg @ w1 + b1, 0.0)                  # Linear + ReLU
    y = h @ w2 + b2                                      # Linear
    y = 1.0 / (1.0 + jnp.exp(-y))                        # Sigmoid
    return y.reshape(B, C, 1, 1)                         # r_weights[0]


if __name__ == "__main__":
    key = jax.random.PRNGKey(0)
    kx, k1, k2, k3, k4 = jax.random.split(key, 5)

    B, dim, H, W = 2, 4, 16, 16
    reduction = 1
    hidden = dim // reduction

    x = jax.random.normal(kx, (B, dim, H, W), jnp.float32)
    # PyTorch nn.Linear stores weight as (out, in); here we pass (in, out).
    w1 = 0.5 * jax.random.normal(k1, (dim, hidden), jnp.float32)
    b1 = 0.1 * jax.random.normal(k2, (hidden,), jnp.float32)
    w2 = 0.5 * jax.random.normal(k3, (hidden, dim), jnp.float32)
    b2 = 0.1 * jax.random.normal(k4, (dim,), jnp.float32)

    out = jax.block_until_ready(rweights_pallas(x, w1, b1, w2, b2))
    ref = jax.block_until_ready(_reference(x, w1, b1, w2, b2))

    np.testing.assert_allclose(np.asarray(out), np.asarray(ref),
                               rtol=1e-5, atol=1e-5)
    print("KERNEL_OK")
</pallas_src>

<mosaic_0001>
module attributes {stable_mosaic.version = 11 : i64} {
  func.func @_rweights_kernel(%arg0: i32, %arg1: i32, %arg2: memref<2x4x256xf32, #tpu.memory_space<vmem>>, %arg3: memref<4x4xf32, #tpu.memory_space<vmem>>, %arg4: memref<1x4xf32, #tpu.memory_space<vmem>>, %arg5: memref<4x4xf32, #tpu.memory_space<vmem>>, %arg6: memref<1x4xf32, #tpu.memory_space<vmem>>, %arg7: memref<2x4xf32, #tpu.memory_space<vmem>>, %arg8: memref<2x4xf32, #tpu.memory_space<vmem>>) attributes {dimension_semantics = [#tpu.dimension_semantics<parallel>, #tpu.dimension_semantics<arbitrary>], iteration_bounds = array<i64: 1, 1>, scalar_prefetch = 0 : i64, scratch_operands = 1 : i64, tpu.core_type = #tpu.core_type<tc>, window_params = [{transform_indices = @transform_0, window_bounds = array<i64: 2, 4, 256>}, {pipeline_mode = #tpu.pipeline_mode<synchronous>, transform_indices = @transform_1, window_bounds = array<i64: 4, 4>}, {pipeline_mode = #tpu.pipeline_mode<synchronous>, transform_indices = @transform_2, window_bounds = array<i64: 1, 4>}, {pipeline_mode = #tpu.pipeline_mode<synchronous>, transform_indices = @transform_3, window_bounds = array<i64: 4, 4>}, {pipeline_mode = #tpu.pipeline_mode<synchronous>, transform_indices = @transform_4, window_bounds = array<i64: 1, 4>}, {transform_indices = @transform_5, window_bounds = array<i64: 2, 4>}]} {
    %c0 = arith.constant 0 : index
    %c0_0 = arith.constant 0 : index
    %c0_1 = arith.constant 0 : index
    %0 = vector.load %arg2[%c0, %c0_0, %c0_1] : memref<2x4x256xf32, #tpu.memory_space<vmem>>, vector<2x4x256xf32>
    %cst = arith.constant dense<0.000000e+00> : vector<2x4xf32>
    %1 = vector.multi_reduction <add>, %0, %cst [2] : vector<2x4x256xf32> to vector<2x4xf32>
    %c0_i32 = arith.constant 0 : i32
    %2 = arith.cmpi eq, %arg1, %c0_i32 : i32
    %3 = arith.extui %2 : i1 to i32
    %c0_i32_2 = arith.constant 0 : i32
    %4 = arith.cmpi ne, %3, %c0_i32_2 : i32
    scf.if %4 {
      %c0_7 = arith.constant 0 : index
      %c0_8 = arith.constant 0 : index
      %11 = vector.load %arg8[%c0_7, %c0_8] : memref<2x4xf32, #tpu.memory_space<vmem>>, vector<2x4xf32>
      tpu.vector_store %arg8[%c0_7, %c0_8], %1 {strides = array<i32>} : memref<2x4xf32, #tpu.memory_space<vmem>>, vector<2x4xf32>,
    } else {
    }
    %c0_i32_3 = arith.constant 0 : i32
    %5 = arith.cmpi sgt, %arg1, %c0_i32_3 : i32
    %6 = arith.extui %5 : i1 to i32
    %c0_i32_4 = arith.constant 0 : i32
    %7 = arith.cmpi ne, %6, %c0_i32_4 : i32
    scf.if %7 {
      %c0_7 = arith.constant 0 : index
      %c0_8 = arith.constant 0 : index
      %11 = vector.load %arg8[%c0_7, %c0_8] : memref<2x4xf32, #tpu.memory_space<vmem>>, vector<2x4xf32>
      %12 = arith.addf %11, %1 : vector<2x4xf32>
      %c0_9 = arith.constant 0 : index
      %c0_10 = arith.constant 0 : index
      %13 = vector.load %arg8[%c0_9, %c0_10] : memref<2x4xf32, #tpu.memory_space<vmem>>, vector<2x4xf32>
      tpu.vector_store %arg8[%c0_9, %c0_10], %12 {strides = array<i32>} : memref<2x4xf32, #tpu.memory_space<vmem>>, vector<2x4xf32>,
    } else {
    }
    %c0_i32_5 = arith.constant 0 : i32
    %8 = arith.cmpi eq, %arg1, %c0_i32_5 : i32
    %9 = arith.extui %8 : i1 to i32
    %c0_i32_6 = arith.constant 0 : i32
    %10 = arith.cmpi ne, %9, %c0_i32_6 : i32
    scf.if %10 {
      %c0_7 = arith.constant 0 : index
      %c0_8 = arith.constant 0 : index
      %11 = vector.load %arg8[%c0_7, %c0_8] : memref<2x4xf32, #tpu.memory_space<vmem>>, vector<2x4xf32>
      %cst_9 = arith.constant 3.906250e-03 : f32
      %12 = vector.broadcast %cst_9 : f32 to vector<2x4xf32>
      %13 = arith.mulf %11, %12 : vector<2x4xf32>
      %c0_10 = arith.constant 0 : index
      %c0_11 = arith.constant 0 : index
      %14 = vector.load %arg3[%c0_10, %c0_11] : memref<4x4xf32, #tpu.memory_space<vmem>>, vector<4x4xf32>
      %cst_12 = arith.constant dense<0.000000e+00> : vector<2x4xf32>
      %15 = tpu.matmul %13, %14, %cst_12 {dimension_numbers = #tpu.dot_dimension_numbers<[1], [0], [0], [1], [0, 0, 1, 1], [], []>} : vector<2x4xf32>, vector<4x4xf32>, vector<2x4xf32> -> vector<2x4xf32>
      %c0_13 = arith.constant 0 : index
      %c0_14 = arith.constant 0 : index
      %16 = vector.load %arg4[%c0_13, %c0_14] : memref<1x4xf32, #tpu.memory_space<vmem>>, vector<1x4xf32>
      %17 = vector.broadcast %16 : vector<1x4xf32> to vector<2x4xf32>
      %18 = arith.addf %15, %17 : vector<2x4xf32>
      %cst_15 = arith.constant 0.000000e+00 : f32
      %19 = vector.broadcast %cst_15 : f32 to vector<2x4xf32>
      %20 = arith.maximumf %18, %19 : vector<2x4xf32>
      %c0_16 = arith.constant 0 : index
      %c0_17 = arith.constant 0 : index
      %21 = vector.load %arg5[%c0_16, %c0_17] : memref<4x4xf32, #tpu.memory_space<vmem>>, vector<4x4xf32>
      %cst_18 = arith.constant dense<0.000000e+00> : vector<2x4xf32>
      %22 = tpu.matmul %20, %21, %cst_18 {dimension_numbers = #tpu.dot_dimension_numbers<[1], [0], [0], [1], [0, 0, 1, 1], [], []>} : vector<2x4xf32>, vector<4x4xf32>, vector<2x4xf32> -> vector<2x4xf32>
      %c0_19 = arith.constant 0 : index
      %c0_20 = arith.constant 0 : index
      %23 = vector.load %arg6[%c0_19, %c0_20] : memref<1x4xf32, #tpu.memory_space<vmem>>, vector<1x4xf32>
      %24 = vector.broadcast %23 : vector<1x4xf32> to vector<2x4xf32>
      %25 = arith.addf %22, %24 : vector<2x4xf32>
      %cst_21 = arith.constant 0.000000e+00 : f32
      %26 = vector.broadcast %cst_21 : f32 to vector<2x4xf32>
      %27 = arith.subf %26, %25 : vector<2x4xf32>
      %28 = math.exp %27 : vector<2x4xf32>
      %cst_22 = arith.constant 1.000000e+00 : f32
      %29 = vector.broadcast %cst_22 : f32 to vector<2x4xf32>
      %30 = arith.addf %29, %28 : vector<2x4xf32>
      %cst_23 = arith.constant 1.000000e+00 : f32
      %31 = vector.broadcast %cst_23 : f32 to vector<2x4xf32>
      %32 = arith.divf %31, %30 : vector<2x4xf32>
      %c0_24 = arith.constant 0 : index
      %c0_25 = arith.constant 0 : index
      %33 = vector.load %arg7[%c0_24, %c0_25] : memref<2x4xf32, #tpu.memory_space<vmem>>, vector<2x4xf32>
      tpu.vector_store %arg7[%c0_24, %c0_25], %32 {strides = array<i32>} : memref<2x4xf32, #tpu.memory_space<vmem>>, vector<2x4xf32>,
    } else {
    }
    return
  }
  func.func @transform_0(%arg0: i32, %arg1: i32) -> (i32, i32, i32) {
    %c0_i32 = arith.constant 0 : i32
    %c0_i32_0 = arith.constant 0 : i32
    return %arg0, %c0_i32, %arg1 : i32, i32, i32
  }
  func.func @transform_1(%arg0: i32, %arg1: i32) -> (i32, i32) {
    %c0_i32 = arith.constant 0 : i32
    %c0_i32_0 = arith.constant 0 : i32
    %c0_i32_1 = arith.constant 0 : i32
    return %c0_i32, %c0_i32_0 : i32, i32
  }
  func.func @transform_2(%arg0: i32, %arg1: i32) -> (i32, i32) {
    %c0_i32 = arith.constant 0 : i32
    %c0_i32_0 = arith.constant 0 : i32
    %c0_i32_1 = arith.constant 0 : i32
    return %c0_i32, %c0_i32_0 : i32, i32
  }
  func.func @transform_3(%arg0: i32, %arg1: i32) -> (i32, i32) {
    %c0_i32 = arith.constant 0 : i32
    %c0_i32_0 = arith.constant 0 : i32
    %c0_i32_1 = arith.constant 0 : i32
    return %c0_i32, %c0_i32_0 : i32, i32
  }
  func.func @transform_4(%arg0: i32, %arg1: i32) -> (i32, i32) {
    %c0_i32 = arith.constant 0 : i32
    %c0_i32_0 = arith.constant 0 : i32
    %c0_i32_1 = arith.constant 0 : i32
    return %c0_i32, %c0_i32_0 : i32, i32
  }
  func.func @transform_5(%arg0: i32, %arg1: i32) -> (i32, i32) {
    %c0_i32 = arith.constant 0 : i32
    %c0_i32_0 = arith.constant 0 : i32
    return %arg0, %c0_i32 : i32, i32
  }
}

</mosaic_0001>

<bundles_post_ra>
// kernel: tpu_custom_call.1
= control target key start
LH: loop header
LB: loop body
LE: loop exit
PB: predicated region body
PF: predicated region fallthrough
CT: control target
= control target key end

     0   :  { %10 = vsyncpa [#allocation4], 0  ;;  %s504_s0 = inlined_call_operand.hbm [shape: f32[2,4,256], index: 0, kind: input, shape index: {}]   ;;  %s505_s1 = inlined_call_operand.hbm [shape: f32[4,4], index: 1, kind: input, shape index: {}]   ;;  %s506_s2 = inlined_call_operand.vmem [shape: f32[1,4], index: 2, kind: input, shape index: {}]   ;;  %s507_s3 = inlined_call_operand.vmem [shape: f32[4,4], index: 3, kind: input, shape index: {}]   ;;  %s508_s4 = inlined_call_operand.vmem [shape: f32[1,4], index: 4, kind: input, shape index: {}]   ;;  %s509_s5 = inlined_call_operand.hbm [shape: f32[2,4], index: 5, kind: output, shape index: {}]  }
   0x1   :  { %11 = vsyncpa [#allocation7], 0 }
   0x2   :  { %12 = vsyncpa [#allocation5], 0  ;;  %s414_s18 = smov [#allocation3]   ;;  %s342_s22 = scalar_lea.hbm %s504_s0, 256 }
   0x3   :  { %s18_s19 = sshll.u32 %s414_s18, 4  ;;  %p343_p0 = scmp.ne.s32.totalorder %s504_s0, %s342_s22  ;;  %s19_s19 = int_to_ptr.vmem [resolvable:$true] %s18_s19 }
   0x4   :  { %p346_p1 = scmp.lt.u32.totalorder %s342_s22, %s504_s0 }
   0x6   :  { %p348_p2 = pnand %p346_p1, %p343_p0 }
   0x8   :  { %351 = shalt.err (!%p348_p2)
}
   0x9   :  { %s352_s27 = scalar_lea.vmem %s19_s19, 256  ;;  %p357_p4 = scmp.lt.s32.totalorder %s19_s19, %s19_s19 }
   0xa   :  { %p353_p3 = scmp.ne.s32.totalorder %s19_s19, %s352_s27  ;;  %p358_p5 = scmp.lt.s32.totalorder %s352_s27, %s352_s27 }
   0xc   :  { %p359_p6 = por %p358_p5, %p357_p4 }
   0xe   :  { %p360_p7 = pnand %p359_p6, %p353_p3 }
  0x10   :  { %363 = shalt.err (!%p360_p7)
}
  0x11   :  { %s415_s28 = smov 128   ;;  %s416_s29 = smov 8  }
  0x12   :  { %24 = dma.hbm_to_vmem [thread:$0]  %s504_s0, 256, %s19_s19, [#allocation4], %s415_s28, %s415_s28, %s416_s29  }
  0x13   :  { %s417_s7 = smov [#allocation6]   ;;  %s364_s11 = scalar_lea.hbm %s505_s1, 64 }
  0x14   :  { %s31_s8 = sshll.u32 %s417_s7, 4  ;;  %p365_p8 = scmp.ne.s32.totalorder %s505_s1, %s364_s11  ;;  %s32_s8 = int_to_ptr.vmem [resolvable:$true] %s31_s8 }
  0x15   :  { %p368_p9 = scmp.lt.u32.totalorder %s364_s11, %s505_s1 }
  0x17   :  { %p370_p10 = pnand %p368_p9, %p365_p8 }
  0x19   :  { %373 = shalt.err (!%p370_p10)
}
  0x1a   :  { %s374_s16 = scalar_lea.vmem %s32_s8, 64  ;;  %p379_p12 = scmp.lt.s32.totalorder %s32_s8, %s32_s8 }
  0x1b   :  { %p375_p11 = scmp.ne.s32.totalorder %s32_s8, %s374_s16  ;;  %p380_p13 = scmp.lt.s32.totalorder %s374_s16, %s374_s16 }
  0x1d   :  { %p381_p0 = por %p380_p13, %p379_p12 }
  0x1f   :  { %p382_p1 = pnand %p381_p0, %p375_p11 }
  0x21   :  { %385 = shalt.err (!%p382_p1)
}
  0x22   :  { %34 = dma.hbm_to_vmem [thread:$0]  %s505_s1, 64, %s32_s8, [#allocation7]  }
  0x23   :  { %408 = dma.done.wait [#allocation4], 256  }
  0x24   :  { %409 = vsyncadd [#allocation4], 4294967040 }
  0x25   :  { %410 = dma.done.wait [#allocation7], 64  }
  0x26   :  { %411 = vsyncadd [#allocation7], 4294967232  ;;  %vm55_vm0 = vcmask 1043456   ;;  %v47_v0 = vld [vmem:[#allocation3] sm:$0xff]  ;;  %v48_v1 = vld [vmem:[#allocation3 + $0x8] sm:$0xff]  ;;  %v418_v11 = vmov 0.0   ;;  %v72_v12 = vlaneseq }
  0x27   :  { %v51_v2 = vcombine.high %v47_v0, %v47_v0  ;;  %v56_v3 = vsel %vm55_vm0, %v47_v0, 0.0  ;;  %v52_v4 = vcombine.high %v48_v1, %v48_v1  ;;  %v61_v6 = vsel %vm55_vm0, %v48_v1, 0.0  ;;  %v115_v10 = vld [vmem:[#allocation6] sm:$0xf]  ;;  %319 = vmatprep.subr.mxu0 %v418_v11  ;;  %324 = vmatprep.subr.mxu1 %v418_v11  ;;  %v201_v23 = vld [vmem:[%s507_s3] sm:$0xf] }
  0x28   :  { %vm419_vm1 = vmmov 0   ;;  %320 = vmatpush3.msk.msra.mxu0 %vm55_vm0, %v115_v10  ;;  %v73_v13 = vand.u32 127, %v72_v12  ;;  %v75_v14 = vshrl.u32 %v72_v12, 7  ;;  %vm82_vm2 = vcmask 1041409   ;;  %325 = vmatpush3.msk.msra.mxu1 %vm55_vm0, %v201_v23  ;;  %v309_v24 = vld [vmem:[%s506_s2] ss:$0 sm:$0xff] }
  0x29   :  { %v57_v5 = vsel %vm55_vm0, %v51_v2, 0.0  ;;  %v62_v7 = vsel %vm55_vm0, %v52_v4, 0.0  ;;  %321 = vmatprep.mubr.msk.f32.mxu0 %vm419_vm1, %v418_v11  ;;  %326 = vmatprep.mubr.msk.f32.mxu1 %vm419_vm1, %v418_v11  ;;  %vm85_vm3 = vcmask 25600   ;;  %vm123_vm4 = vcmask 31744   ;;  %v312_v29 = vld [vmem:[%s508_s4] ss:$0 sm:$0xff] }
  0x2a   :  { %v58_v8 = vadd.f32 %v57_v5, %v56_v3  ;;  %v63_v9 = vadd.f32 %v62_v7, %v61_v6  ;;  %v76_v16 = vsub.s32 %v73_v13, %v75_v14  ;;  %s420_s3 = smov [#allocation8]  }
  0x2b   :  { %s299_s2 = sshll.u32 %s420_s3, 4  ;;  %s300_s2 = int_to_ptr.vmem [resolvable:$true] %s299_s2 }
  0x2c   :  { %59 = vadd.xlane.f32.xlu0 %v58_v8  ;;  %s386_s23 = scalar_lea.vmem %s300_s2, 32  ;;  %p391_p3 = scmp.lt.s32.totalorder %s300_s2, %s300_s2 }
  0x2d   :  { %p387_p2 = scmp.ne.s32.totalorder %s300_s2, %s386_s23  ;;  %p392_p4 = scmp.lt.s32.totalorder %s386_s23, %s386_s23 }
  0x2f   :  { %p393_p5 = por %p392_p4, %p391_p3 }
  0x30   :  { %64 = vadd.xlane.f32.xlu0 %v63_v9 }
  0x31   :  { %p394_p6 = pnand %p393_p5, %p387_p2 }
  0xb9   :  { %v60_v15 = vpop.xlane.xlu0 %59 }
  0xba   :  { %v77_v18 = vrot.slane %v60_v15, %v76_v16 }
  0xbd   :  { %v65_v17 = vpop.xlane.xlu0 %64 }
  0xbe   :  { %v81_v19 = vrot.slane %v65_v17, %v76_v16 }
  0xc0   :  { %v83_v20 = vsel %vm82_vm2, %v81_v19, %v77_v18 }
  0xc1   :  { %86 = vst.msk [vmem:[#allocation2] sm:$0x3] %vm85_vm3, %v83_v20 }
  0xc8   :  { %v113_v21 = vld [vmem:[#allocation2] sm:$0x3] }
  0xc9   :  { %v114_v22 = vmul.f32 0.00390625, %v113_v21 }
  0xcb   :  { %322 = vmatmul.mubr.msk.f32.vlgmr.msra.gmra.mrb[0].mxu0 %vm123_vm4, %v114_v22 }
 0x19e   :  { %v196_v25 = vpop.f32.mrb[0].mxu0 }
 0x19f   :  { %v197_v26 = vadd.f32 %v309_v24, %v196_v25  ;;  %v323_v27 = vpop.f32.mrb[1].mxu0 }
 0x1a1   :  { %v200_v28 = vmax.f32 %v197_v26, 0.0 }
 0x1a3   :  { %327 = vmatmul.mubr.msk.f32.vlgmr.msra.gmra.mrb[0].mxu1 %vm123_vm4, %v200_v28 }
 0x276   :  { %v281_v30 = vpop.f32.mrb[0].mxu1 }
 0x277   :  { %v282_v31 = vadd.f32 %v312_v29, %v281_v30  ;;  %v328_v32 = vpop.f32.mrb[1].mxu1 }
 0x279   :  { %v285_v33 = vsub.f32 0.0, %v282_v31 }
 0x27b   :  { %v286_v34 = vmul.f32 1.442695, %v285_v33 }
 0x27d   :  { %338 = vpow2.f32 %v286_v34 }
 0x287   :  { %v339_v35 = vpop.eup %338 }
 0x288   :  { %v288_v36 = vadd.f32 1.0, %v339_v35 }
 0x28a   :  { %340 = vrcp.f32 %v288_v36 }
 0x294   :  { %v341_v37 = vpop.eup %340 }
 0x295   :  { %292 = vst.msk [vmem:[#allocation8] sm:$0x3] %vm85_vm3, %v341_v37 }
 0x296   :  { %397 = shalt.err (!%p394_p6)
}
 0x297   :  { %s398_s25 = scalar_lea.hbm %s509_s5, 32 }
 0x298   :  { %p399_p7 = scmp.ne.s32.totalorder %s509_s5, %s398_s25  ;;  %p402_p8 = scmp.lt.u32.totalorder %s398_s25, %s509_s5 }
 0x29a   :  { %p404_p9 = pnand %p402_p8, %p399_p7 }
 0x29c   :  { %407 = shalt.err (!%p404_p9)
}
 0x29d   :  { %302 = dma.vmem_to_hbm [thread:$0]  %s300_s2, 32, %s509_s5, [#allocation5]  }
 0x29e   :  { %412 = dma.done.wait [#allocation5], 32  }
 0x29f   :  { %413 = vsyncadd [#allocation5], 4294967264 }
 0x2a0   :  { %306 = vsyncpa [#allocation4], 1 }
 0x2a1   :  { %307 = vsyncpa [#allocation7], 1 }
 0x2a2   :  { %308 = vsyncpa [#allocation5], 1 }

</bundles_post_ra>
